<compile_context>
chip_gen: v6e
topology: v6e:2x2x1
jax: 0.10.0
libtpu: 0.0.40
codegen_flags: <defaults>
</compile_context>

<pallas_src>
import jax
import jax.numpy as jnp
from jax.experimental import pallas as pl
from jax.experimental.pallas import tpu as pltpu


_SUBLANE = 8     # row (second-to-last) block-dim granularity for f32


def _round_up(x, m):
    return ((x + m - 1) // m) * m


def _vmem_limit_bytes(tm, d):
    """Scoped-VMEM request: double-buffered f32 I/O tiles + (double-buffered)
    bf16 weight slabs + live f32 temporaries, with headroom, capped at 75% of
    the generation's physical VMEM."""
    tile = tm * d * 4
    io = 2 * 3 * tile                                   # x1, x2, out (2 bufs each)
    weights = 2 * (d * d * 2 + d * 2 * d * 2            # Wq + Wk|Wv bf16 (2 bufs)
                   + d * 4 + 2 * d * 4)                 # biases f32
    live = 10 * tile + 2 * tm * 2 * d * 4               # q, kv, k, v, attn, casts, slack
    est = int(1.4 * (io + weights + live)) + (2 << 20)
    try:
        phys = int(getattr(pltpu.get_tpu_info(), "vmem_capacity_bytes", 64 << 20))
    except Exception:  # pragma: no cover - conservative fallback (v7x physical)
        phys = 64 << 20
    cap = (phys * 3) // 4
    return max(min(est, cap), min(32 << 20, cap))


def _cross_attn_fusion_kernel(x1_ref, x2_ref, wq_ref, bq_ref, wkv_ref, bkv_ref,
                              o_ref):
    # x1 stays f32 for the residual path; bf16 copies feed the MXU.
    x1_f32 = x1_ref[...]
    x1_bf16 = x1_f32.astype(jnp.bfloat16)
    x2_bf16 = x2_ref[...].astype(jnp.bfloat16)        # in-kernel cast (free under DMA)

    # Projections: bf16 operands on the MXU, f32 accumulation, f32 bias add.
    q = jnp.dot(x1_bf16, wq_ref[...], preferred_element_type=jnp.float32) + bq_ref[...]
    kv = jnp.dot(x2_bf16, wkv_ref[...], preferred_element_type=jnp.float32) + bkv_ref[...]

    d = q.shape[-1]
    k = kv[:, :d]
    v = kv[:, d:]

    # Gated fusion + residual on the VPU/EUP; single store of the row tile.
    attn = jax.nn.sigmoid(q * k)
    o_ref[...] = (attn * v + x1_f32).astype(o_ref.dtype)


def prepare_params(wq, bq, wk, bk, wv, bv):
    """One-time weight prep (model-init time, NOT per forward call):
    transpose PyTorch (out, in) weights to (in, out), cast to bf16, and fuse
    the K and V projections into one (D, 2D) slab. Biases stay f32 (added
    after the f32 accumulation). No lane padding: activations stream at their
    true feature width, so weights match it."""
    d = wq.shape[0]
    wq_t = wq.T.astype(jnp.bfloat16)                              # (D, D)
    wkv_t = jnp.concatenate([wk.T, wv.T], axis=1).astype(jnp.bfloat16)  # (D, 2D)
    bq_p = bq.astype(jnp.float32).reshape(1, d)                   # (1, D)
    bkv_p = jnp.concatenate([bk, bv]).astype(jnp.float32).reshape(1, 2 * d)
    return wq_t, bq_p, wkv_t, bkv_p


def cross_attention_fusion(x1, x2, params, *, tm=1024):
    """x1, x2: (B, S, D) float32. params: output of prepare_params().
    Returns (B, S, D) in x1.dtype."""
    wq_t, bq_p, wkv_t, bkv_p = params
    B, S, D = x1.shape
    assert wq_t.shape == (D, D) and wkv_t.shape == (D, 2 * D)

    M = B * S
    # Row tile: large (amortizes ~0.35us per-grid-step overhead), but shrunk
    # so the grid has >= 2 steps when M allows — on v7x the "parallel" grid
    # axis is the only thing that shards work across the 2 TensorCores.
    tm_eff = min(tm, _round_up(M, _SUBLANE))
    if pl.cdiv(M, tm_eff) < 2 and M >= 2 * _SUBLANE:
        tm_eff = _round_up(pl.cdiv(M, 2), _SUBLANE)
    grid = (pl.cdiv(M, tm_eff),)            # ragged trailing block: no HBM pad pass

    x1_2d = x1.reshape(M, D)                # free reshapes, no pad / no cast pass
    x2_2d = x2.reshape(M, D)

    row_spec = pl.BlockSpec((tm_eff, D), lambda i: (i, 0))
    # Weight / bias blocks are grid-invariant (constant index_map), so they are
    # fetched once and stay VMEM-resident across the row loop.
    wq_spec = pl.BlockSpec((D, D), lambda i: (0, 0))
    bq_spec = pl.BlockSpec((1, D), lambda i: (0, 0))
    wkv_spec = pl.BlockSpec((D, 2 * D), lambda i: (0, 0))
    bkv_spec = pl.BlockSpec((1, 2 * D), lambda i: (0, 0))

    out_2d = pl.pallas_call(
        _cross_attn_fusion_kernel,
        out_shape=jax.ShapeDtypeStruct((M, D), x1.dtype),
        grid=grid,
        in_specs=[row_spec, row_spec, wq_spec, bq_spec, wkv_spec, bkv_spec],
        out_specs=row_spec,
        compiler_params=pltpu.CompilerParams(
            dimension_semantics=("parallel",),
            vmem_limit_bytes=_vmem_limit_bytes(tm_eff, D),
        ),
    )(x1_2d, x2_2d, wq_t, bq_p, wkv_t, bkv_p)

    return out_2d.reshape(B, S, D)


def _reference(x1, x2, wq, bq, wk, bk, wv, bv):
    q = x1 @ wq.T + bq
    k = x2 @ wk.T + bk
    v = x2 @ wv.T + bv
    attn = jax.nn.sigmoid(q * k)
    return attn * v + x1


if __name__ == "__main__":
    key = jax.random.PRNGKey(0)
    B, S, D = 2, 8, 32

    keys = jax.random.split(key, 8)
    x1 = jax.random.normal(keys[0], (B, S, D), dtype=jnp.float32)
    x2 = jax.random.normal(keys[1], (B, S, D), dtype=jnp.float32)

    # Deterministic parameter init (shapes match nn.Linear(dim, dim)).
    scale = 1.0 / jnp.sqrt(D)
    wq = jax.random.uniform(keys[2], (D, D), jnp.float32, -scale, scale)
    bq = jax.random.uniform(keys[3], (D,), jnp.float32, -scale, scale)
    wk = jax.random.uniform(keys[4], (D, D), jnp.float32, -scale, scale)
    bk = jax.random.uniform(keys[5], (D,), jnp.float32, -scale, scale)
    wv = jax.random.uniform(keys[6], (D, D), jnp.float32, -scale, scale)
    bv = jax.random.uniform(keys[7], (D,), jnp.float32, -scale, scale)

    # One-time weight prep (transpose + bf16 + K|V fusion).
    params = prepare_params(wq, bq, wk, bk, wv, bv)

    out = cross_attention_fusion(x1, x2, params)
    out = jax.block_until_ready(out)

    ref = _reference(x1, x2, wq, bq, wk, bk, wv, bv)
    assert out.shape == (B, S, D)
    # bf16 MXU operands (f32 accumulation) -> slightly looser tolerance than
    # the all-f32 reference.
    assert jnp.allclose(out, ref, atol=2e-2, rtol=2e-2), "mismatch vs reference"

    print("KERNEL_OK")
</pallas_src>

<mosaic_0001>
module attributes {stable_mosaic.version = 11 : i64} {
  func.func @_cross_attn_fusion_kernel(%arg0: i32, %arg1: memref<8x32xf32, #tpu.memory_space<vmem>>, %arg2: memref<8x32xf32, #tpu.memory_space<vmem>>, %arg3: memref<32x32xbf16, #tpu.memory_space<vmem>>, %arg4: memref<1x32xf32, #tpu.memory_space<vmem>>, %arg5: memref<32x64xbf16, #tpu.memory_space<vmem>>, %arg6: memref<1x64xf32, #tpu.memory_space<vmem>>, %arg7: memref<8x32xf32, #tpu.memory_space<vmem>>) attributes {dimension_semantics = [#tpu.dimension_semantics<parallel>], iteration_bounds = array<i64: 2>, scalar_prefetch = 0 : i64, scratch_operands = 0 : i64, tpu.core_type = #tpu.core_type<tc>, window_params = [{transform_indices = @transform_0, window_bounds = array<i64: 8, 32>}, {transform_indices = @transform_1, window_bounds = array<i64: 8, 32>}, {pipeline_mode = #tpu.pipeline_mode<synchronous>, transform_indices = @transform_2, window_bounds = array<i64: 32, 32>}, {pipeline_mode = #tpu.pipeline_mode<synchronous>, transform_indices = @transform_3, window_bounds = array<i64: 1, 32>}, {pipeline_mode = #tpu.pipeline_mode<synchronous>, transform_indices = @transform_4, window_bounds = array<i64: 32, 64>}, {pipeline_mode = #tpu.pipeline_mode<synchronous>, transform_indices = @transform_5, window_bounds = array<i64: 1, 64>}, {transform_indices = @transform_6, window_bounds = array<i64: 8, 32>}]} {
    %c0 = arith.constant 0 : index
    %c0_0 = arith.constant 0 : index
    %0 = vector.load %arg1[%c0, %c0_0] : memref<8x32xf32, #tpu.memory_space<vmem>>, vector<8x32xf32>
    %1 = arith.truncf %0 : vector<8x32xf32> to vector<8x32xbf16>
    %c0_1 = arith.constant 0 : index
    %c0_2 = arith.constant 0 : index
    %2 = vector.load %arg2[%c0_1, %c0_2] : memref<8x32xf32, #tpu.memory_space<vmem>>, vector<8x32xf32>
    %3 = arith.truncf %2 : vector<8x32xf32> to vector<8x32xbf16>
    %c0_3 = arith.constant 0 : index
    %c0_4 = arith.constant 0 : index
    %4 = vector.load %arg3[%c0_3, %c0_4] : memref<32x32xbf16, #tpu.memory_space<vmem>>, vector<32x32xbf16>
    %cst = arith.constant dense<0.000000e+00> : vector<8x32xf32>
    %5 = tpu.matmul %1, %4, %cst {dimension_numbers = #tpu.dot_dimension_numbers<[1], [0], [0], [1], [0, 0, 1, 1], [], []>} : vector<8x32xbf16>, vector<32x32xbf16>, vector<8x32xf32> -> vector<8x32xf32>
    %c0_5 = arith.constant 0 : index
    %c0_6 = arith.constant 0 : index
    %6 = vector.load %arg4[%c0_5, %c0_6] : memref<1x32xf32, #tpu.memory_space<vmem>>, vector<1x32xf32>
    %7 = vector.broadcast %6 : vector<1x32xf32> to vector<8x32xf32>
    %8 = arith.addf %5, %7 : vector<8x32xf32>
    %c0_7 = arith.constant 0 : index
    %c0_8 = arith.constant 0 : index
    %9 = vector.load %arg5[%c0_7, %c0_8] : memref<32x64xbf16, #tpu.memory_space<vmem>>, vector<32x64xbf16>
    %cst_9 = arith.constant dense<0.000000e+00> : vector<8x64xf32>
    %10 = tpu.matmul %3, %9, %cst_9 {dimension_numbers = #tpu.dot_dimension_numbers<[1], [0], [0], [1], [0, 0, 1, 1], [], []>} : vector<8x32xbf16>, vector<32x64xbf16>, vector<8x64xf32> -> vector<8x64xf32>
    %c0_10 = arith.constant 0 : index
    %c0_11 = arith.constant 0 : index
    %11 = vector.load %arg6[%c0_10, %c0_11] : memref<1x64xf32, #tpu.memory_space<vmem>>, vector<1x64xf32>
    %12 = vector.broadcast %11 : vector<1x64xf32> to vector<8x64xf32>
    %13 = arith.addf %10, %12 : vector<8x64xf32>
    %14 = vector.extract_strided_slice %13 {offsets = [0, 0], sizes = [8, 32], strides = [1, 1]} : vector<8x64xf32> to vector<8x32xf32>
    %15 = vector.extract_strided_slice %13 {offsets = [0, 32], sizes = [8, 32], strides = [1, 1]} : vector<8x64xf32> to vector<8x32xf32>
    %16 = arith.mulf %8, %14 : vector<8x32xf32>
    %17 = arith.negf %16 : vector<8x32xf32>
    %18 = math.exp %17 : vector<8x32xf32>
    %cst_12 = arith.constant 1.000000e+00 : f32
    %19 = vector.broadcast %cst_12 : f32 to vector<8x32xf32>
    %20 = arith.addf %19, %18 : vector<8x32xf32>
    %21 = arith.divf %19, %20 : vector<8x32xf32>
    %22 = arith.mulf %21, %15 : vector<8x32xf32>
    %23 = arith.addf %22, %0 : vector<8x32xf32>
    %c0_13 = arith.constant 0 : index
    %c0_14 = arith.constant 0 : index
    %24 = vector.load %arg7[%c0_13, %c0_14] : memref<8x32xf32, #tpu.memory_space<vmem>>, vector<8x32xf32>
    tpu.vector_store %arg7[%c0_13, %c0_14], %23 {strides = array<i32>} : memref<8x32xf32, #tpu.memory_space<vmem>>, vector<8x32xf32>,
    return
  }
  func.func @transform_0(%arg0: i32) -> (i32, i32) {
    %c0_i32 = arith.constant 0 : i32
    %c0_i32_0 = arith.constant 0 : i32
    return %arg0, %c0_i32 : i32, i32
  }
  func.func @transform_1(%arg0: i32) -> (i32, i32) {
    %c0_i32 = arith.constant 0 : i32
    %c0_i32_0 = arith.constant 0 : i32
    return %arg0, %c0_i32 : i32, i32
  }
  func.func @transform_2(%arg0: i32) -> (i32, i32) {
    %c0_i32 = arith.constant 0 : i32
    %c0_i32_0 = arith.constant 0 : i32
    %c0_i32_1 = arith.constant 0 : i32
    return %c0_i32, %c0_i32_0 : i32, i32
  }
  func.func @transform_3(%arg0: i32) -> (i32, i32) {
    %c0_i32 = arith.constant 0 : i32
    %c0_i32_0 = arith.constant 0 : i32
    %c0_i32_1 = arith.constant 0 : i32
    return %c0_i32, %c0_i32_0 : i32, i32
  }
  func.func @transform_4(%arg0: i32) -> (i32, i32) {
    %c0_i32 = arith.constant 0 : i32
    %c0_i32_0 = arith.constant 0 : i32
    %c0_i32_1 = arith.constant 0 : i32
    return %c0_i32, %c0_i32_0 : i32, i32
  }
  func.func @transform_5(%arg0: i32) -> (i32, i32) {
    %c0_i32 = arith.constant 0 : i32
    %c0_i32_0 = arith.constant 0 : i32
    %c0_i32_1 = arith.constant 0 : i32
    return %c0_i32, %c0_i32_0 : i32, i32
  }
  func.func @transform_6(%arg0: i32) -> (i32, i32) {
    %c0_i32 = arith.constant 0 : i32
    %c0_i32_0 = arith.constant 0 : i32
    return %arg0, %c0_i32 : i32, i32
  }
}

</mosaic_0001>

<bundles_post_ra>
// kernel: tpu_custom_call.1
= control target key start
LH: loop header
LB: loop body
LE: loop exit
PB: predicated region body
PF: predicated region fallthrough
CT: control target
= control target key end

     0   :  { %s1207_s0 = inlined_call_operand.hbm [shape: f32[16,32], index: 0, kind: input, shape index: {}]   ;;  %s1208_s1 = inlined_call_operand.hbm [shape: f32[16,32], index: 1, kind: input, shape index: {}]   ;;  %s1209_s2 = inlined_call_operand.hbm [shape: bf16[32,32], index: 2, kind: input, shape index: {}]   ;;  %s1210_s3 = inlined_call_operand.vmem [shape: f32[1,32], index: 3, kind: input, shape index: {}]   ;;  %s1211_s4 = inlined_call_operand.hbm [shape: bf16[32,64], index: 4, kind: input, shape index: {}]   ;;  %s1212_s5 = inlined_call_operand.vmem [shape: f32[1,64], index: 5, kind: input, shape index: {}]   ;;  %s1213_s6 = inlined_call_operand.hbm [shape: f32[16,32], index: 6, kind: output, shape index: {}]  }
   0x1   :  { %1218 = sst [smem:[#allocation17_spill]] %s1209_s2 }
   0x2   :  { %1219 = sst [smem:[#allocation18_spill]] %s1211_s4 }
   0x3   :  { %11 = vsyncpa [#allocation3], 0 }
   0x4   :  { %13 = vsyncpa [#allocation3 + $0x1], 0 }
   0x5   :  { %14 = vsyncpa [#allocation6], 0 }
   0x6   :  { %16 = vsyncpa [#allocation6 + $0x1], 0 }
   0x7   :  { %17 = vsyncpa [#allocation9], 0 }
   0x8   :  { %18 = vsyncpa [#allocation4], 0 }
   0x9   :  { %20 = vsyncpa [#allocation4 + $0x1], 0  ;;  %s977_s21 = smov 0   ;;  %s979_s22 = smov 0  }
   0xa   :  { %s981_s23 = smov 0   ;;  %s983_s24 = smov 0  }
   0xb LB: > { %s998_s25 = sadd.s32 4294967295, %s930_s24   ;;  %s611_s26 = sadd.s32 4294967294, %s930_s24   ;;  %s930_s24 = sphi %s983_s24, %s1243_s24   ;;  %s926_s23 = sphi %s981_s23, %s1242_s23   ;;  %s922_s22 = sphi %s979_s22, %s1241_s22   ;;  %s918_s21 = sphi %s977_s21, %s1240_s21  }
   0xc   : > { %p46_p0 = scmp.ne.s32.totalorder %s922_s22, %s918_s21  ;;  %p1214_p1 = scmp.eq.s32.totalorder %s998_s25, 0 }
   0xd   : > { %p186_p3 = scmp.eq.s32.totalorder %s611_s26, 1  ;;  %p612_p5 = scmp.ge.s32.totalorder %s930_s24, 1 }
   0xe   : > { %p1007_p4 = por %p1214_p1, %p46_p0  ;;  %p193_p7 = scmp.lt.s32.totalorder %s930_s24, 3 }
   0xf   : > { %p1012_p6 = por %p186_p3, %p46_p0  ;;  %s932_s30 = smov [#allocation7]  }
  0x10   : > { %s1220_s27 = scalar_select %p1007_p4, 1, 0 }
  0x11   : > { %s1221_s28 = scalar_select %p1012_p6, 1, 0 }
  0x12   : > { %p1017_p8 = pnand %p612_p5, %p193_p7  ;;  %s205_s7 = sshll.u32 %s932_s30, 4  ;;  %s206_s7 = int_to_ptr.vmem [resolvable:$true] %s205_s7 }
  0x13   : > { %s933_s9 = smov [#allocation8]   ;;  %s757_s11 = scalar_lea.vmem %s206_s7, 256 }
  0x14   : > { %s1222_s29 = scalar_select %p1017_p8, 1, 0 }
  0x15   : > { %p675_p9 = pneg %p1017_p8  ;;  %s221_s10 = sshll.u32 %s933_s9, 4  ;;  %s222_s10 = int_to_ptr.vmem [resolvable:$true] %s221_s10 }
  0x16   : > { %p758_p13 = scmp.ne.s32.totalorder %s206_s7, %s757_s11  ;;  %p765_p5 = scmp.lt.s32.totalorder %s206_s7, %s206_s7 }
  0x17   : > { %p1026_p11 = pnand %p675_p9, %p1214_p1  ;;  %p766_p7 = scmp.lt.s32.totalorder %s757_s11, %s757_s11 }
  0x19   : > { %p748_p12 = pneg %p1026_p11  ;;  %p767_p10 = por %p766_p7, %p765_p5 }
  0x1b   : > { %p760_p0 = pnand %p758_p13, %p748_p12 }
  0x1d   : > { %p761_p3 = pneg %p760_p0 }
  0x1f   : > { %p768_p9 = pnand %p767_p10, %p761_p3 }
  0x21   : > { %771 = shalt.err (!%p768_p9)
}
  0x22   : > { %s934_s12 = smov 64   ;;  %s935_s13 = smov 4  }
  0x23   : > { %s1224_s2 = sld [smem:[#allocation17_spill]]  ;;  %s783_s16 = scalar_lea.vmem %s222_s10, 256 }
  0x24   : > { %p784_p1 = scmp.ne.s32.totalorder %s222_s10, %s783_s16  ;;  %p791_p2 = scmp.lt.s32.totalorder %s222_s10, %s222_s10 }
  0x25   : > { %p792_p6 = scmp.lt.s32.totalorder %s783_s16, %s783_s16 }
  0x26   : > { %p786_p13 = pnand %p784_p1, %p748_p12 }
  0x27   : > { %p793_p5 = por %p792_p6, %p791_p2 }
  0x28   : > { %p787_p0 = pneg %p786_p13 }
  0x29   : > { %678 = dma.hbm_to_vmem [thread:$0]  (!%p1026_p11), %s1224_s2, 256, %s206_s7, [#allocation6], %s934_s12, %s934_s12, %s935_s13  }
  0x2a   : > { %p794_p10 = pnand %p793_p5, %p787_p0 }
  0x2c   : > { %797 = shalt.err (!%p794_p10)
}
  0x2d   : > { %s1225_s4 = sld [smem:[#allocation18_spill]]  ;;  %s1049_s19 = sadd.s32 1, %s930_s24  }
  0x2e   : > { %s33_s20 = sadd.s32 1, %s926_s23  ;;  %s30_s26 = ssub.s32 %s930_s24, %s1049_s19 }
  0x2f   : > { %p40_p1 = scmp.ne.s32.totalorder %s926_s23, %s922_s22  ;;  %p31_p2 = scmp.eq.s32.totalorder %s30_s26, 0 }
  0x30   : > { %p41_p6 = scmp.eq.s32.totalorder %s930_s24, 0  ;;  %p1226_p12 = scmp.eq.s32.totalorder %s998_s25, 1 }
  0x31   : > { %p695_p7 = scmp.lt.s32.totalorder %s930_s24, 2  ;;  %s238_s8 = sand.u32 1, %s926_s23  }
  0x32   : > { %p1059_p3 = por %p1226_p12, %p40_p1  ;;  %p42_p9 = por %p41_p6, %p40_p1 }
  0x33   : > { %681 = dma.hbm_to_vmem [thread:$0]  (!%p1026_p11), %s1225_s4, 256, %s222_s10, [#allocation9], %s934_s12, %s934_s12, %s935_s13  }
  0x34   : > { %s1227_s30 = scalar_select %p1059_p3, 1, 0 }
  0x35   : > { %s1065_s7 = scalar_select %p31_p2, %s926_s23, %s33_s20  }
  0x36   : > { %s1068_s9 = sshll.u32 %s238_s8, 3  ;;  %s617_s10 = sshll.u32 %s930_s24, 7 }
  0x37   : > { %1228 = sst [smem:[#allocation16_spill]] %s1065_s7  ;;  %s1074_s13 = scalar_lea.hbm %s1207_s0, %s617_s10 }
  0x38   : > { %s242_s14 = scalar_lea.vmem [#allocation2], %s1068_s9  ;;  %p1079_p11 = pnand %p695_p7, %p42_p9 }
  0x39   : > { %s249_s15 = sshll.u32 %s242_s14, 4  ;;  %s1086_s20 = scalar_lea.hbm %s1208_s1, %s617_s10  ;;  %s1077_s15 = int_to_ptr.vmem [resolvable:$true] %s249_s15 }
  0x3a   : > { %s256_s26 = sand.u32 1, %s930_s24   ;;  %s239_s11 = scalar_lea.sflag [#allocation3], %s238_s8 }
  0x3b   : > { %s798_s12 = scalar_lea.hbm %s1074_s13, 128  ;;  %p800_p0 = pneg %p1079_p11 }
  0x3c   : > { %p799_p13 = scmp.ne.s32.totalorder %s1074_s13, %s798_s12  ;;  %s803_s4 = scalar_lea.hbm %s1207_s0, 256 }
  0x3d   : > { %p804_p1 = scmp.lt.s32.totalorder %s1074_s13, %s1207_s0  ;;  %p805_p2 = scmp.lt.s32.totalorder %s803_s4, %s798_s12 }
  0x3e   : > { %p801_p5 = pnand %p800_p0, %p799_p13 }
  0x3f   : > { %p806_p6 = por %p805_p2, %p804_p1 }
  0x40   : > { %p802_p10 = pneg %p801_p5 }
  0x42   : > { %p807_p12 = pnand %p806_p6, %p802_p10 }
  0x44   : > { %810 = shalt.err (!%p807_p12)
}
  0x45   : > { %s811_s8 = scalar_lea.vmem %s1077_s15, 128  ;;  %s936_s2 = smov [#allocation2]  }
  0x46   : > { %p812_p7 = scmp.ne.s32.totalorder %s1077_s15, %s811_s8  ;;  %s816_s10 = sshll.u32 %s936_s2, 4  ;;  %s817_s10 = int_to_ptr.vmem [resolvable:$false] %s816_s10 }
  0x47   : > { %s818_s18 = scalar_lea.vmem %s817_s10, 256  ;;  %p819_p5 = scmp.lt.s32.totalorder %s1077_s15, %s817_s10 }
  0x48   : > { %p814_p9 = pnand %p812_p7, %p800_p0  ;;  %p820_p3 = scmp.lt.s32.totalorder %s818_s18, %s811_s8 }
  0x4a   : > { %p815_p13 = pneg %p814_p9  ;;  %p821_p4 = por %p820_p3, %p819_p5 }
  0x4c   : > { %p822_p1 = pnand %p821_p4, %p815_p13 }
  0x4e   : > { %825 = shalt.err (!%p822_p1)
}
  0x4f   : > { %685 = dma.hbm_to_vmem [thread:$0]  (!%p1079_p11), %s1074_s13, 128, %s1077_s15, %s239_s11  }
  0x50   : > { %s260_s4 = scalar_lea.vmem [#allocation5], %s1068_s9  ;;  %s257_s12 = scalar_lea.sflag [#allocation6], %s256_s26 }
  0x51   : > { %s267_s7 = sshll.u32 %s260_s4, 4  ;;  %s826_s14 = scalar_lea.hbm %s1086_s20, 128  ;;  %s268_s7 = int_to_ptr.vmem [resolvable:$true] %s267_s7 }
  0x52   : > { %p827_p3 = scmp.ne.s32.totalorder %s1086_s20, %s826_s14  ;;  %s831_s2 = scalar_lea.hbm %s1208_s1, 256 }
  0x53   : > { %p832_p2 = scmp.lt.s32.totalorder %s1086_s20, %s1208_s1  ;;  %p833_p6 = scmp.lt.s32.totalorder %s831_s2, %s826_s14 }
  0x54   : > { %p829_p4 = pnand %p827_p3, %p800_p0 }
  0x55   : > { %p834_p12 = por %p833_p6, %p832_p2 }
  0x56   : > { %p830_p10 = pneg %p829_p4 }
  0x58   : > { %p835_p7 = pnand %p834_p12, %p830_p10 }
  0x5a   : > { %838 = shalt.err (!%p835_p7)
}
  0x5b   : > { %s839_s9 = scalar_lea.vmem %s268_s7, 128  ;;  %s937_s13 = smov [#allocation5]  }
  0x5c   : > { %p840_p9 = scmp.ne.s32.totalorder %s268_s7, %s839_s9  ;;  %s844_s15 = sshll.u32 %s937_s13, 4  ;;  %s845_s15 = int_to_ptr.vmem [resolvable:$false] %s844_s15 }
  0x5d   : > { %s846_s26 = scalar_lea.vmem %s845_s15, 256  ;;  %p847_p1 = scmp.lt.s32.totalorder %s268_s7, %s845_s15 }
  0x5e   : > { %p842_p13 = pnand %p840_p9, %p800_p0  ;;  %p848_p3 = scmp.lt.s32.totalorder %s846_s26, %s839_s9 }
  0x60   : > { %p843_p5 = pneg %p842_p13  ;;  %p849_p4 = por %p848_p3, %p847_p1 }
  0x62   : > { %p850_p8 = pnand %p849_p4, %p843_p5 }
  0x64   : > { %853 = shalt.err (!%p850_p8)
}
  0x65   : > { %688 = dma.hbm_to_vmem [thread:$0]  (!%p1079_p11), %s1086_s20, 128, %s268_s7, %s257_s12  }
  0x66   : > { %p1230_p10 = scmp.ne.s32.totalorder %s1222_s29, 0 }
  0x67   : > { %s1137_s11 = sand.u32 (!%p1230_p10), 1, %s922_s22   ;;  %p1231_p0 = scmp.ne.s32.totalorder (!%p1230_p10), %s1220_s27, 0 }
  0x68   : > { %276 = sbr.rel (%p1230_p10) target bundleno = 456 (0x1c8), region = 44  ;;  %s1140_s4 = sshll.u32 (!%p1230_p10), %s1137_s11, 3 }
  0x69   : > { %s279_s14 = scalar_lea.sflag (!%p1230_p10), [#allocation3], %s1137_s11  ;;  %s282_s17 = scalar_lea.vmem (!%p1230_p10), [#allocation2], %s1140_s4 }
  0x6d   : > { %897 = dma.done.wait (%p1231_p0), %s279_s14, 128  }
  0x6e   : > { %899 = vsyncadd (%p1231_p0), %s279_s14, 4294967168  ;;  %s287_s29 = sand.u32 1, %s998_s25   ;;  %s291_s20 = scalar_lea.vmem [#allocation5], %s1140_s4 }
  0x6f   : > { %s288_s16 = scalar_lea.sflag [#allocation6], %s287_s29 }
  0x70   : > { %901 = dma.done.wait (%p1231_p0), %s288_s16, 128  }
  0x71   : > { %903 = vsyncadd (%p1231_p0), %s288_s16, 4294967168  ;;  %p1232_p8 = scmp.eq.s32.totalorder %s998_s25, 0 }
  0x73   : > { %905 = dma.done.wait (%p1232_p8), [#allocation6], 256   ;;  %p1233_p11 = pmov %p1232_p8 }
  0x74   : > { %p1234_p2 = pmov %p1232_p8 }
  0x75   : > { %907 = vsyncadd (%p1233_p11), [#allocation6], 4294967040 }
  0x76   : > { %909 = dma.done.wait (%p1234_p2), [#allocation9], 256   ;;  %p1235_p6 = pmov %p1234_p2 }
  0x77   : > { %v938_v0 = vmov 0.0   ;;  %vm939_vm0 = vmmov 0   ;;  %v738_v1 = vld [vmem:[#allocation7 + $0x8] sm:$0xff]   ;;  %v739_v2 = vld [vmem:[#allocation8 + $0x8] sm:$0xff]   ;;  %v740_v3 = vld [vmem:[#allocation7] sm:$0xff]   ;;  %vm361_vm1 = vcmask 261120  }
  0x78   : > { %911 = vsyncadd (%p1235_p6), [#allocation9], 4294967040  ;;  %645 = vmatprep.subr.bf16.mxu0 %v938_v0  ;;  %653 = vmatprep.subr.bf16.mxu1 %v938_v0  ;;  %v741_v4 = vld [vmem:[#allocation8] sm:$0xff]   ;;  %v334_v5 = vld [vmem:[%s282_s17] sm:$0xff]  ;;  %s940_s2 = smov 96   ;;  %s636_s10 = sshll.u32 %s998_s25, 7 }
  0x79   : > { %649 = vmatprep.mubr.msk.bf16.mxu0 %vm939_vm0, %v938_v0  ;;  %657 = vmatprep.mubr.msk.bf16.mxu1 %vm939_vm0, %v938_v0  ;;  %v336_v6 = vld [vmem:[%s291_s20] sm:$0xff]  ;;  %v335_v7 = vpack.c.bf16 %v334_v5, %v334_v5  ;;  %v626_v9 = vld [vmem:[%s1210_s3] ss:$0 sm:$0xff]  ;;  %s332_s18 = scalar_lea.vmem [#allocation10], %s1140_s4  ;;  %s497_s26 = scalar_lea.hbm %s1213_s6, %s636_s10 }
  0x7a   : > { %646 = vmatpush3.bf16.msra.mxu0 %v738_v1  ;;  %654 = vmatpush3.bf16.msra.mxu1 %v739_v2  ;;  %v337_v8 = vpack.c.bf16 %v336_v6, %v336_v6  ;;  %v630_v10 = vld [vmem:[%s1212_s5] ss:$0 sm:$0xff]  ;;  %s499_s9 = sshll.u32 %s332_s18, 4  ;;  %s486_s14 = scalar_lea.sflag [#allocation4], %s1137_s11  ;;  %s500_s9 = int_to_ptr.vmem [resolvable:$true] %s499_s9 }
  0x7b   : > { %647 = vmatprep.subr.bf16.mxu0 %v938_v0  ;;  %655 = vmatprep.subr.bf16.mxu1 %v938_v0  ;;  %s854_s17 = scalar_lea.vmem %s500_s9, 128  ;;  %p1236_p7 = scmp.ne.s32.totalorder %s1227_s30, 0 }
  0x7c   : > { %p855_p12 = scmp.ne.s32.totalorder %s500_s9, %s854_s17  ;;  %s941_s29 = smov [#allocation10]  }
  0x7d   : > { %s858_s16 = sshll.u32 %s941_s29, 4  ;;  %s859_s16 = int_to_ptr.vmem [resolvable:$false] %s858_s16 }
  0x7e   : > { %648 = vmatpush3.bf16.msra.mxu0 %v740_v3  ;;  %656 = vmatpush3.bf16.msra.mxu1 %v741_v4  ;;  %p856_p9 = pnand %p855_p12, %p1236_p7  ;;  %s860_s25 = scalar_lea.vmem %s859_s16, 256 }
  0x7f   : > { %p861_p5 = scmp.lt.s32.totalorder %s500_s9, %s859_s16  ;;  %p862_p1 = scmp.lt.s32.totalorder %s860_s25, %s854_s17 }
  0x80   : > { %p857_p13 = pneg %p856_p9 }
  0x81   : > { %650 = vmatmul.mubr.msk.bf16.vlgmr.msra.gmra.mxu0 %vm361_vm1, %v335_v7  ;;  %658 = vmatmul.mubr.msk.bf16.vlgmr.msra.gmra.mxu1 %vm361_vm1, %v337_v8  ;;  %p863_p3 = por %p862_p1, %p861_p5 }
  0x83   : > { %p864_p4 = pnand %p863_p3, %p857_p13 }
 0x141   : > { %v399_v11 = vpop.f32.mrf.mxu0  ;;  %v465_v13 = vpop.f32.mrf.mxu1 }
 0x142   : > { %v400_v12 = vadd.f32 %v626_v9, %v399_v11  ;;  %v466_v14 = vadd.f32 %v630_v10, %v465_v13 }
 0x143   : > { %v651_v15 = vpop.f32.mrf.mxu0  ;;  %v659_v16 = vpop.f32.mrf.mxu1 }
 0x144   : > { %v471_v17 = vmul.f32 %v466_v14, %v400_v12  ;;  %479 = vrot.lane.b32.xlu0 %v466_v14, %s940_s2 }
 0x145   : > { %v402_v18 = vpop.f32.mrf.mxu0  ;;  %v468_v19 = vpop.f32.mrf.mxu1 }
 0x146   : > { %v634_v22 = vmul.f32 -1.442695, %v471_v17 }
 0x147   : > { %v652_v20 = vpop.f32.mrf.mxu0  ;;  %v660_v21 = vpop.f32.mrf.mxu1 }
 0x148   : > { %742 = vpow2.f32 %v634_v22 }
 0x155   : > { %v743_v23 = vpop.eup %742 }
 0x156   : > { %v475_v24 = vadd.f32 1.0, %v743_v23 }
 0x158   : > { %744 = vrcp.f32 %v475_v24 }
 0x165   : > { %v745_v25 = vpop.eup %744 }
 0x1b6   : > { %v480_v26 = vpop.permute.xlu0 %479 }
 0x1b7   : > { %v482_v27 = vmul.f32 %v745_v25, %v480_v26 }
 0x1b9   : > { %v483_v28 = vadd.f32 %v482_v27, %v334_v5 }
 0x1bb   : > { %484 = vst.msk [vmem:[%s332_s18] sm:$0xff] %vm361_vm1, %v483_v28 }
 0x1bc   : > { %867 = shalt.err (!%p864_p4)
}
 0x1bd   : > { %s868_s4 = scalar_lea.hbm %s497_s26, 128  ;;  %s872_s27 = scalar_lea.hbm %s1213_s6, 256 }
 0x1be   : > { %p869_p10 = scmp.ne.s32.totalorder %s497_s26, %s868_s4  ;;  %p873_p11 = scmp.lt.s32.totalorder %s497_s26, %s1213_s6 }
 0x1bf   : > { %p874_p2 = scmp.lt.s32.totalorder %s872_s27, %s868_s4 }
 0x1c0   : > { %p870_p0 = pnand %p869_p10, %p1236_p7 }
 0x1c1   : > { %p875_p6 = por %p874_p2, %p873_p11 }
 0x1c2   : > { %p871_p8 = pneg %p870_p0 }
 0x1c4   : > { %p876_p12 = pnand %p875_p6, %p871_p8 }
 0x1c6   : > { %879 = shalt.err (!%p876_p12)
}
 0x1c7   : > { %673 = dma.vmem_to_hbm [thread:$0]  (%p1236_p7), %s500_s9, 128, %s497_s26, %s486_s14  }
 0x1c8 PF: > { %s511_s8 = sand.u32 1, %s918_s21   ;;  %p1237_p9 = scmp.ne.s32.totalorder %s1221_s28, 0 }
 0x1c9   : > { %p1238_p13 = scmp.ge.s32.totalorder %s930_s24, 2  ;;  %s512_s2 = scalar_lea.sflag [#allocation4], %s511_s8 }
 0x1cb   : > { %p690_p5 = pnand %p1238_p13, %p1237_p9 }
 0x1cd   : > { %p691_p1 = pneg %p690_p5 }
 0x1cf   : > { %913 = dma.done.wait (%p691_p1), %s512_s2, 128  }
 0x1d0   : > { %915 = vsyncadd (%p691_p1), %s512_s2, 4294967168  ;;  %s1239_s10 = sld [smem:[#allocation16_spill]]  ;;  %p23_p3 = scmp.ge.s32.totalorder %s1049_s19, 4  }
 0x1d1   : > { %s1240_s21 = smov %s922_s22  ;;  %s1241_s22 = smov %s926_s23 }
 0x1d2   : > { %s1243_s24 = smov %s1049_s19  ;;  %25 = sbr.rel (!%p23_p3) target bundleno = 11 (0xb), region = 110 }
 0x1d6   : > { %s1242_s23 = smov %s1239_s10 }
 0x1d7   :  { %517 = vsyncpa [#allocation3], 1 }
 0x1d8   :  { %519 = vsyncpa [#allocation3 + $0x1], 1 }
 0x1d9   :  { %520 = vsyncpa [#allocation6], 1 }
 0x1da   :  { %522 = vsyncpa [#allocation6 + $0x1], 1 }
 0x1db   :  { %523 = vsyncpa [#allocation9], 1 }
 0x1dc   :  { %524 = vsyncpa [#allocation4], 1 }
 0x1dd   :  { %526 = vsyncpa [#allocation4 + $0x1], 1 }

</bundles_post_ra>
